<compile_context>
chip_gen: v7x
topology: tpu7x:2x2x1
jax: 0.10.0
libtpu: 0.0.40
codegen_flags: <defaults>
</compile_context>

<pallas_src>
import jax
import jax.numpy as jnp
from jax.experimental import pallas as pl
from jax.experimental.pallas import tpu as pltpu


def attention_kernel(xq_ref, xkv_ref, wq_ref, wk_ref, wv_ref, wp_ref, b_ref,
                     o_ref, acc_ref):
    """One (batch, query-tile, head) grid step.

    xq_ref : (1, TQ, C) bf16  query rows of this batch element
    xkv_ref: (1, N,  C) bf16  full sequence (source of K / V)
    wq_ref : (1, C, hd) bf16  this head's Q weight (softmax scale pre-folded)
    wk_ref : (1, C, hd) bf16
    wv_ref : (1, C, hd) bf16
    wp_ref : (1, hd, C) bf16  this head's slice of the output projection
    b_ref  : (1, C)     f32   output-projection bias
    o_ref  : (1, TQ, C)       output block (written on the last head)
    acc_ref: (TQ, C)    f32   VMEM accumulator over heads
    """
    h = pl.program_id(2)

    @pl.when(h == 0)
    def _init():
        acc_ref[...] = jnp.zeros_like(acc_ref)

    xq = xq_ref[0]                                               # (TQ, C) bf16
    xkv = xkv_ref[0]                                             # (N, C)  bf16

    # Per-head projections: full-C contraction on the MXU, f32 accumulation.
    # The softmax scale is already folded into wq (done on the host).
    q = jnp.dot(xq, wq_ref[0], preferred_element_type=jnp.float32)   # (TQ, hd)
    k = jnp.dot(xkv, wk_ref[0], preferred_element_type=jnp.float32)  # (N, hd)
    v = jnp.dot(xkv, wv_ref[0], preferred_element_type=jnp.float32)  # (N, hd)

    # Attention scores (bf16 MXU operands, f32 result) + f32 softmax.
    s = jnp.einsum("qd,kd->qk",
                   q.astype(jnp.bfloat16), k.astype(jnp.bfloat16),
                   preferred_element_type=jnp.float32)               # (TQ, N)
    s = s - jnp.max(s, axis=-1, keepdims=True)
    p = jnp.exp(s)
    p = p * pl.reciprocal(jnp.sum(p, axis=-1, keepdims=True), approx=True)
    # attn_drop = Dropout(0.0) -> identity

    ctx = jnp.dot(p.astype(jnp.bfloat16), v.astype(jnp.bfloat16),
                  preferred_element_type=jnp.float32)                # (TQ, hd)

    # This head's contribution to the output projection, accumulated in f32.
    acc_ref[...] += jnp.dot(ctx.astype(jnp.bfloat16), wp_ref[0],
                            preferred_element_type=jnp.float32)      # (TQ, C)

    @pl.when(h == pl.num_programs(2) - 1)
    def _finalize():
        out = acc_ref[...] + b_ref[...]          # (1, C) bias broadcasts
        # proj_drop = Dropout(0.0) -> identity
        o_ref[0] = out.astype(o_ref.dtype)


def attention_forward(x, w_qkv, w_proj, b_proj, *, num_heads, block_q=None):
    """MHSA forward matching the PyTorch module.

    x      : (B, N, C)
    w_qkv  : (C, 3C)  nn.Linear(dim, 3*dim).weight transposed; columns ordered (3, H, hd)
    w_proj : (C, C)   nn.Linear(dim, dim).weight transposed
    b_proj : (C,)
    """
    B, N, C = x.shape
    H = num_heads
    hd = C // H
    scale = hd ** (-0.5)

    # ---- host-side parameter prep: split q/k/v, fold scale into Wq,
    # ---- per-head layout, bf16 MXU operands.
    wq = w_qkv[:, 0 * C:1 * C] * scale
    wk = w_qkv[:, 1 * C:2 * C]
    wv = w_qkv[:, 2 * C:3 * C]

    def per_head(w):  # (C, C) -> (H, C, hd)
        return jnp.transpose(w.reshape(C, H, hd), (1, 0, 2)).astype(jnp.bfloat16)

    wq_h, wk_h, wv_h = per_head(wq), per_head(wk), per_head(wv)
    wp_h = w_proj.reshape(H, hd, C).astype(jnp.bfloat16)          # (H, hd, C)
    b2 = b_proj.reshape(1, C).astype(jnp.float32)
    xb = x.astype(jnp.bfloat16)

    if block_q is None:
        block_q = 128 if (N % 128 == 0) else N                    # query tiling
    assert N % block_q == 0
    grid = (B, N // block_q, H)                                   # heads innermost

    return pl.pallas_call(
        attention_kernel,
        out_shape=jax.ShapeDtypeStruct((B, N, C), x.dtype),
        grid=grid,
        in_specs=[
            pl.BlockSpec((1, block_q, C), lambda b, q, h: (b, q, 0)),  # x (queries)
            pl.BlockSpec((1, N, C),       lambda b, q, h: (b, 0, 0)),  # x (keys/values)
            pl.BlockSpec((1, C, hd),      lambda b, q, h: (h, 0, 0)),  # per-head Wq (scaled)
            pl.BlockSpec((1, C, hd),      lambda b, q, h: (h, 0, 0)),  # per-head Wk
            pl.BlockSpec((1, C, hd),      lambda b, q, h: (h, 0, 0)),  # per-head Wv
            pl.BlockSpec((1, hd, C),      lambda b, q, h: (h, 0, 0)),  # per-head Wproj
            pl.BlockSpec((1, C),          lambda b, q, h: (0, 0)),     # proj bias
        ],
        out_specs=pl.BlockSpec((1, block_q, C), lambda b, q, h: (b, q, 0)),
        scratch_shapes=[pltpu.VMEM((block_q, C), jnp.float32)],
        compiler_params=pltpu.CompilerParams(
            dimension_semantics=("parallel", "parallel", "arbitrary")),
    )(xb, xb, wq_h, wk_h, wv_h, wp_h, b2)


def attention_reference(x, w_qkv, w_proj, b_proj, *, num_heads):
    """Pure-JAX f32 reference mirroring the PyTorch forward."""
    B, N, C = x.shape
    hd = C // num_heads
    scale = hd ** (-0.5)
    qkv = x @ w_qkv                                               # (B, N, 3C)
    qkv = qkv.reshape(B, N, 3, num_heads, hd).transpose(2, 0, 3, 1, 4)
    q, k, v = qkv[0], qkv[1], qkv[2]                              # (B, H, N, hd)
    attn = jnp.einsum("bhqd,bhkd->bhqk", q, k) * scale
    attn = jax.nn.softmax(attn, axis=-1)
    ctx = jnp.einsum("bhqk,bhkd->bhqd", attn, v)                  # (B, H, N, hd)
    ctx = ctx.transpose(0, 2, 1, 3).reshape(B, N, C)
    return ctx @ w_proj + b_proj.reshape(1, C)


if __name__ == "__main__":
    # Small shapes consistent with the module: dim=32, 4 heads, seq=8, batch=2.
    B, N, C = 2, 8, 32
    num_heads = 4

    key = jax.random.PRNGKey(0)
    kx, kqkv, kproj, kbias = jax.random.split(key, 4)

    x = jax.random.normal(kx, (B, N, C), dtype=jnp.float32)
    # Deterministic parameters, stored as (in, out) for the kernel.
    w_qkv = jax.random.normal(kqkv, (C, 3 * C), dtype=jnp.float32) * 0.05
    w_proj = jax.random.normal(kproj, (C, C), dtype=jnp.float32) * 0.05
    b_proj = jax.random.normal(kbias, (C,), dtype=jnp.float32) * 0.05

    out = attention_forward(x, w_qkv, w_proj, b_proj, num_heads=num_heads)
    out = jax.block_until_ready(out)

    ref = attention_reference(x, w_qkv, w_proj, b_proj, num_heads=num_heads)
    assert out.shape == (B, N, C)
    # bf16 MXU operands + approx reciprocal -> looser tolerance vs the f32 reference.
    assert jnp.allclose(out, ref, atol=2e-2, rtol=2e-2), "mismatch vs reference"

    print("KERNEL_OK")
</pallas_src>

<mosaic_0001>
module attributes {stable_mosaic.version = 11 : i64} {
  func.func @attention_kernel(%arg0: i32, %arg1: i32, %arg2: i32, %arg3: memref<1x8x32xbf16, #tpu.memory_space<vmem>>, %arg4: memref<1x8x32xbf16, #tpu.memory_space<vmem>>, %arg5: memref<1x32x8xbf16, #tpu.memory_space<vmem>>, %arg6: memref<1x32x8xbf16, #tpu.memory_space<vmem>>, %arg7: memref<1x32x8xbf16, #tpu.memory_space<vmem>>, %arg8: memref<1x8x32xbf16, #tpu.memory_space<vmem>>, %arg9: memref<1x32xf32, #tpu.memory_space<vmem>>, %arg10: memref<1x8x32xf32, #tpu.memory_space<vmem>>, %arg11: memref<8x32xf32, #tpu.memory_space<vmem>>) attributes {dimension_semantics = [#tpu.dimension_semantics<parallel>, #tpu.dimension_semantics<parallel>, #tpu.dimension_semantics<arbitrary>], iteration_bounds = array<i64: 2, 1, 4>, scalar_prefetch = 0 : i64, scratch_operands = 1 : i64, tpu.core_type = #tpu.core_type<tc>, window_params = [{transform_indices = @transform_0, window_bounds = array<i64: 1, 8, 32>}, {transform_indices = @transform_1, window_bounds = array<i64: 1, 8, 32>}, {transform_indices = @transform_2, window_bounds = array<i64: 1, 32, 8>}, {transform_indices = @transform_3, window_bounds = array<i64: 1, 32, 8>}, {transform_indices = @transform_4, window_bounds = array<i64: 1, 32, 8>}, {transform_indices = @transform_5, window_bounds = array<i64: 1, 8, 32>}, {pipeline_mode = #tpu.pipeline_mode<synchronous>, transform_indices = @transform_6, window_bounds = array<i64: 1, 32>}, {transform_indices = @transform_7, window_bounds = array<i64: 1, 8, 32>}]} {
    %c0_i32 = arith.constant 0 : i32
    %0 = arith.cmpi eq, %arg2, %c0_i32 : i32
    %1 = arith.extui %0 : i1 to i32
    %c0_i32_0 = arith.constant 0 : i32
    %2 = arith.cmpi ne, %1, %c0_i32_0 : i32
    scf.if %2 {
      %cst_30 = arith.constant 0.000000e+00 : f32
      %42 = vector.broadcast %cst_30 : f32 to vector<8x32xf32>
      %c0_31 = arith.constant 0 : index
      %c0_32 = arith.constant 0 : index
      %43 = vector.load %arg11[%c0_31, %c0_32] : memref<8x32xf32, #tpu.memory_space<vmem>>, vector<8x32xf32>
      tpu.vector_store %arg11[%c0_31, %c0_32], %42 {strides = array<i32>} : memref<8x32xf32, #tpu.memory_space<vmem>>, vector<8x32xf32>,
    } else {
    }
    %c0 = arith.constant 0 : index
    %c0_1 = arith.constant 0 : index
    %c0_2 = arith.constant 0 : index
    %3 = vector.load %arg3[%c0, %c0_1, %c0_2] : memref<1x8x32xbf16, #tpu.memory_space<vmem>>, vector<1x8x32xbf16>
    %4 = vector.shape_cast %3 : vector<1x8x32xbf16> to vector<8x32xbf16>
    %c0_3 = arith.constant 0 : index
    %c0_4 = arith.constant 0 : index
    %c0_5 = arith.constant 0 : index
    %5 = vector.load %arg4[%c0_3, %c0_4, %c0_5] : memref<1x8x32xbf16, #tpu.memory_space<vmem>>, vector<1x8x32xbf16>
    %6 = vector.shape_cast %5 : vector<1x8x32xbf16> to vector<8x32xbf16>
    %c0_6 = arith.constant 0 : index
    %c0_7 = arith.constant 0 : index
    %c0_8 = arith.constant 0 : index
    %7 = vector.load %arg5[%c0_6, %c0_7, %c0_8] : memref<1x32x8xbf16, #tpu.memory_space<vmem>>, vector<1x32x8xbf16>
    %8 = vector.shape_cast %7 : vector<1x32x8xbf16> to vector<32x8xbf16>
    %cst = arith.constant dense<0.000000e+00> : vector<8x8xf32>
    %9 = tpu.matmul %4, %8, %cst {dimension_numbers = #tpu.dot_dimension_numbers<[1], [0], [0], [1], [0, 0, 1, 1], [], []>} : vector<8x32xbf16>, vector<32x8xbf16>, vector<8x8xf32> -> vector<8x8xf32>
    %c0_9 = arith.constant 0 : index
    %c0_10 = arith.constant 0 : index
    %c0_11 = arith.constant 0 : index
    %10 = vector.load %arg6[%c0_9, %c0_10, %c0_11] : memref<1x32x8xbf16, #tpu.memory_space<vmem>>, vector<1x32x8xbf16>
    %11 = vector.shape_cast %10 : vector<1x32x8xbf16> to vector<32x8xbf16>
    %cst_12 = arith.constant dense<0.000000e+00> : vector<8x8xf32>
    %12 = tpu.matmul %6, %11, %cst_12 {dimension_numbers = #tpu.dot_dimension_numbers<[1], [0], [0], [1], [0, 0, 1, 1], [], []>} : vector<8x32xbf16>, vector<32x8xbf16>, vector<8x8xf32> -> vector<8x8xf32>
    %c0_13 = arith.constant 0 : index
    %c0_14 = arith.constant 0 : index
    %c0_15 = arith.constant 0 : index
    %13 = vector.load %arg7[%c0_13, %c0_14, %c0_15] : memref<1x32x8xbf16, #tpu.memory_space<vmem>>, vector<1x32x8xbf16>
    %14 = vector.shape_cast %13 : vector<1x32x8xbf16> to vector<32x8xbf16>
    %cst_16 = arith.constant dense<0.000000e+00> : vector<8x8xf32>
    %15 = tpu.matmul %6, %14, %cst_16 {dimension_numbers = #tpu.dot_dimension_numbers<[1], [0], [0], [1], [0, 0, 1, 1], [], []>} : vector<8x32xbf16>, vector<32x8xbf16>, vector<8x8xf32> -> vector<8x8xf32>
    %16 = arith.truncf %9 : vector<8x8xf32> to vector<8x8xbf16>
    %17 = arith.truncf %12 : vector<8x8xf32> to vector<8x8xbf16>
    "tpu.trace_start"() <{level = 10 : i32, message = "qd,kd->qk"}> : () -> ()
    %cst_17 = arith.constant dense<0.000000e+00> : vector<8x8xf32>
    %18 = tpu.matmul %16, %17, %cst_17 {dimension_numbers = #tpu.dot_dimension_numbers<[1], [1], [0], [0], [0, 0, 1, 0], [], []>} : vector<8x8xbf16>, vector<8x8xbf16>, vector<8x8xf32> -> vector<8x8xf32>
    "tpu.trace_stop"() : () -> ()
    %cst_18 = arith.constant dense<0xFF800000> : vector<8xf32>
    %19 = vector.multi_reduction <maximumf>, %18, %cst_18 [1] : vector<8x8xf32> to vector<8xf32>
    %20 = vector.shape_cast %19 : vector<8xf32> to vector<8x1xf32>
    %21 = vector.broadcast %20 : vector<8x1xf32> to vector<8x8xf32>
    %22 = arith.subf %18, %21 : vector<8x8xf32>
    %23 = math.exp %22 : vector<8x8xf32>
    %cst_19 = arith.constant dense<0.000000e+00> : vector<8xf32>
    %24 = vector.multi_reduction <add>, %23, %cst_19 [1] : vector<8x8xf32> to vector<8xf32>
    %25 = vector.shape_cast %24 : vector<8xf32> to vector<8x1xf32>
    %26 = tpu.reciprocal %25 {approx = true} : vector<8x1xf32> -> vector<8x1xf32>
    %27 = vector.broadcast %26 : vector<8x1xf32> to vector<8x8xf32>
    %28 = arith.mulf %23, %27 : vector<8x8xf32>
    %29 = arith.truncf %28 : vector<8x8xf32> to vector<8x8xbf16>
    %30 = arith.truncf %15 : vector<8x8xf32> to vector<8x8xbf16>
    %cst_20 = arith.constant dense<0.000000e+00> : vector<8x8xf32>
    %31 = tpu.matmul %29, %30, %cst_20 {dimension_numbers = #tpu.dot_dimension_numbers<[1], [0], [0], [1], [0, 0, 1, 1], [], []>} : vector<8x8xbf16>, vector<8x8xbf16>, vector<8x8xf32> -> vector<8x8xf32>
    %c0_21 = arith.constant 0 : index
    %c0_22 = arith.constant 0 : index
    %32 = vector.load %arg11[%c0_21, %c0_22] : memref<8x32xf32, #tpu.memory_space<vmem>>, vector<8x32xf32>
    %33 = arith.truncf %31 : vector<8x8xf32> to vector<8x8xbf16>
    %c0_23 = arith.constant 0 : index
    %c0_24 = arith.constant 0 : index
    %c0_25 = arith.constant 0 : index
    %34 = vector.load %arg8[%c0_23, %c0_24, %c0_25] : memref<1x8x32xbf16, #tpu.memory_space<vmem>>, vector<1x8x32xbf16>
    %35 = vector.shape_cast %34 : vector<1x8x32xbf16> to vector<8x32xbf16>
    %cst_26 = arith.constant dense<0.000000e+00> : vector<8x32xf32>
    %36 = tpu.matmul %33, %35, %cst_26 {dimension_numbers = #tpu.dot_dimension_numbers<[1], [0], [0], [1], [0, 0, 1, 1], [], []>} : vector<8x8xbf16>, vector<8x32xbf16>, vector<8x32xf32> -> vector<8x32xf32>
    %37 = arith.addf %32, %36 : vector<8x32xf32>
    %c0_27 = arith.constant 0 : index
    %c0_28 = arith.constant 0 : index
    %38 = vector.load %arg11[%c0_27, %c0_28] : memref<8x32xf32, #tpu.memory_space<vmem>>, vector<8x32xf32>
    tpu.vector_store %arg11[%c0_27, %c0_28], %37 {strides = array<i32>} : memref<8x32xf32, #tpu.memory_space<vmem>>, vector<8x32xf32>,
    %c3_i32 = arith.constant 3 : i32
    %39 = arith.cmpi eq, %arg2, %c3_i32 : i32
    %40 = arith.extui %39 : i1 to i32
    %c0_i32_29 = arith.constant 0 : i32
    %41 = arith.cmpi ne, %40, %c0_i32_29 : i32
    scf.if %41 {
      %c0_30 = arith.constant 0 : index
      %c0_31 = arith.constant 0 : index
      %42 = vector.load %arg11[%c0_30, %c0_31] : memref<8x32xf32, #tpu.memory_space<vmem>>, vector<8x32xf32>
      %c0_32 = arith.constant 0 : index
      %c0_33 = arith.constant 0 : index
      %43 = vector.load %arg9[%c0_32, %c0_33] : memref<1x32xf32, #tpu.memory_space<vmem>>, vector<1x32xf32>
      %44 = vector.broadcast %43 : vector<1x32xf32> to vector<8x32xf32>
      %45 = arith.addf %42, %44 : vector<8x32xf32>
      %c0_34 = arith.constant 0 : index
      %c0_35 = arith.constant 0 : index
      %c0_36 = arith.constant 0 : index
      %46 = vector.load %arg10[%c0_34, %c0_35, %c0_36] : memref<1x8x32xf32, #tpu.memory_space<vmem>>, vector<1x8x32xf32>
      %47 = vector.shape_cast %46 : vector<1x8x32xf32> to vector<8x32xf32>
      %48 = vector.shape_cast %45 : vector<8x32xf32> to vector<1x8x32xf32>
      tpu.vector_store %arg10[%c0_34, %c0_35, %c0_36], %48 {strides = array<i32>} : memref<1x8x32xf32, #tpu.memory_space<vmem>>, vector<1x8x32xf32>,
    } else {
    }
    return
  }
  func.func @transform_0(%arg0: i32, %arg1: i32, %arg2: i32) -> (i32, i32, i32) {
    %c0_i32 = arith.constant 0 : i32
    %c0_i32_0 = arith.constant 0 : i32
    return %arg0, %arg1, %c0_i32 : i32, i32, i32
  }
  func.func @transform_1(%arg0: i32, %arg1: i32, %arg2: i32) -> (i32, i32, i32) {
    %c0_i32 = arith.constant 0 : i32
    %c0_i32_0 = arith.constant 0 : i32
    %c0_i32_1 = arith.constant 0 : i32
    return %arg0, %c0_i32, %c0_i32_0 : i32, i32, i32
  }
  func.func @transform_2(%arg0: i32, %arg1: i32, %arg2: i32) -> (i32, i32, i32) {
    %c0_i32 = arith.constant 0 : i32
    %c0_i32_0 = arith.constant 0 : i32
    %c0_i32_1 = arith.constant 0 : i32
    return %arg2, %c0_i32, %c0_i32_0 : i32, i32, i32
  }
  func.func @transform_3(%arg0: i32, %arg1: i32, %arg2: i32) -> (i32, i32, i32) {
    %c0_i32 = arith.constant 0 : i32
    %c0_i32_0 = arith.constant 0 : i32
    %c0_i32_1 = arith.constant 0 : i32
    return %arg2, %c0_i32, %c0_i32_0 : i32, i32, i32
  }
  func.func @transform_4(%arg0: i32, %arg1: i32, %arg2: i32) -> (i32, i32, i32) {
    %c0_i32 = arith.constant 0 : i32
    %c0_i32_0 = arith.constant 0 : i32
    %c0_i32_1 = arith.constant 0 : i32
    return %arg2, %c0_i32, %c0_i32_0 : i32, i32, i32
  }
  func.func @transform_5(%arg0: i32, %arg1: i32, %arg2: i32) -> (i32, i32, i32) {
    %c0_i32 = arith.constant 0 : i32
    %c0_i32_0 = arith.constant 0 : i32
    %c0_i32_1 = arith.constant 0 : i32
    return %arg2, %c0_i32, %c0_i32_0 : i32, i32, i32
  }
  func.func @transform_6(%arg0: i32, %arg1: i32, %arg2: i32) -> (i32, i32) {
    %c0_i32 = arith.constant 0 : i32
    %c0_i32_0 = arith.constant 0 : i32
    %c0_i32_1 = arith.constant 0 : i32
    return %c0_i32, %c0_i32_0 : i32, i32
  }
  func.func @transform_7(%arg0: i32, %arg1: i32, %arg2: i32) -> (i32, i32, i32) {
    %c0_i32 = arith.constant 0 : i32
    %c0_i32_0 = arith.constant 0 : i32
    return %arg0, %arg1, %c0_i32 : i32, i32, i32
  }
}

</mosaic_0001>

<bundles_post_ra>
// kernel: tpu_custom_call.1
= control target key start
LH: loop header
LB: loop body
LE: loop exit
PB: predicated region body
PF: predicated region fallthrough
CT: control target
= control target key end

     0   :  { %s1414_s0 = inlined_call_operand.vmem [shape: bf16[2,8,32], index: 0, kind: input, shape index: {}]   ;;  %s1415_s1 = inlined_call_operand.vmem [shape: bf16[2,8,32], index: 1, kind: input, shape index: {}]   ;;  %s1416_s2 = inlined_call_operand.vmem [shape: bf16[4,32,8], index: 2, kind: input, shape index: {}]   ;;  %s1417_s3 = inlined_call_operand.vmem [shape: bf16[4,32,8], index: 3, kind: input, shape index: {}]   ;;  %s1418_s4 = inlined_call_operand.vmem [shape: bf16[4,32,8], index: 4, kind: input, shape index: {}]   ;;  %s1419_s5 = inlined_call_operand.vmem [shape: bf16[4,8,32], index: 5, kind: input, shape index: {}]   ;;  %s1420_s6 = inlined_call_operand.vmem [shape: f32[1,32], index: 6, kind: input, shape index: {}]   ;;  %s1421_s7 = inlined_call_operand.hbm [shape: f32[2,8,32], index: 7, kind: output, shape index: {}]  }
   0x1   :  { %1431 = sst [smem:[#allocation15_spill]] %s1414_s0 }
   0x2   :  { %12 = vsyncpa [#allocation4], 0 }
   0x3   :  { %14 = vsyncpa [#allocation4 + $0x1], 0  ;;  %s1228_s24 = smov 0   ;;  %s1230_s25 = smov 0  }
   0x4   :  { %s1232_s26 = smov 0   ;;  %s1234_s27 = smov 0  }
   0x5   :  { %s1236_s28 = smov 0   ;;  %s1238_s29 = smov 0  }
   0x6   :  { %s1240_s30 = smov 0   ;;  %s1242_s8 = smov 0  }
   0x7 LB: > { %1432 = sst [smem:[#allocation6_spill]] %s1154_s24  ;;  %s910_s9 = sadd.s32 4294967295, %s1182_s8   ;;  %s1182_s8 = sphi %s1242_s8, %s20_s8   ;;  %s1178_s30 = sphi %s1240_s30, %s1453_s30   ;;  %s1174_s29 = sphi %s1238_s29, %s1457_s29   ;;  %s1170_s28 = sphi %s1236_s28, %s1451_s28   ;;  %s1166_s27 = sphi %s1234_s27, %s1450_s27   ;;  %s1162_s26 = sphi %s1232_s26, %s1456_s26   ;;  %s1158_s25 = sphi %s1230_s25, %s1455_s25   ;;  %s1154_s24 = sphi %s1228_s24, %s1454_s24  }
   0x8   : > { %1433 = sst [smem:[#allocation7_spill]] %s1162_s26  ;;  %s911_s10 = sadd.s32 4294967294, %s1182_s8  }
   0x9   : > { %1434 = sst [smem:[#allocation8_spill]] %s1174_s29  ;;  %s32_s11 = sadd.s32 1, %s1174_s29 }
   0xa   : > { %1435 = sst [smem:[#allocation9_spill]] %s1178_s30  ;;  %p33_p0 = scmp.ge.s32.totalorder %s32_s11, 4 }
   0xb   : > { %1436 = sst [smem:[#allocation10_spill]] %s1182_s8  ;;  %s39_s12 = sadd.s32 1, %s1178_s30 }
   0xc   : > { %p237_p1 = scmp.ne.s32.totalorder %s1162_s26, %s1158_s25  ;;  %p238_p2 = scmp.eq.s32.totalorder %s910_s9, 7 }
   0xd   : > { %s1459_s11 = smov (%p33_p0, %s32_s11), 0  ;;  %s1461_s12 = smov (!%p33_p0, %s39_s12), %s1178_s30 }
   0xe   : > { %1437 = sst [smem:[#allocation11_spill]] %s1459_s11  ;;  %p1277_p3 = por %p238_p2, %p237_p1 }
   0xf   : > { %p243_p4 = scmp.ne.s32.totalorder %s1158_s25, %s1154_s24  ;;  %p41_p5 = scmp.ge.s32.totalorder %s1461_s12, 2 }
  0x10   : > { %p244_p6 = scmp.eq.s32.totalorder %s911_s10, 7  ;;  %p914_p7 = scmp.ge.s32.totalorder %s1182_s8, 1 }
  0x11   : > { %p313_p8 = scmp.lt.s32.totalorder %s1182_s8, 9  ;;  %s1463_s12 = smov (%p41_p5, %s1461_s12), 0 }
  0x12   : > { %1439 = sst [smem:[#allocation12_spill]] %s1463_s12  ;;  %p1287_p9 = por %p244_p6, %p243_p4 }
  0x13   : > { %p314_p10 = pnand %p914_p7, %p313_p8  ;;  %s222_s15 = ssub.s32 %s1178_s30, %s1463_s12 }
  0x14   : > { %s1440_s14 = scalar_select %p1287_p9, 1, 0 }
  0x15   : > { %s227_s16 = sadd.s32 1, %s1162_s26  ;;  %p225_p11 = scmp.eq.s32.totalorder %s222_s15, 0 }
  0x16   : > { %1441 = sst [smem:[#allocation13_spill]] %s1440_s14  ;;  %317 = sbr.rel (%p314_p10) target bundleno = 1261 (0x4ed), region = 48 }
  0x17   : > { %s1295_s17 = scalar_select %p225_p11, %s1162_s26, %s227_s16  }
  0x18   : > { %s1425_s18 = sand.u32 (!%p314_p10), 1, %s1158_s25   ;;  %p370_p12 = scmp.lt.s32.totalorder (!%p314_p10), %s1170_s28, 1 }
  0x19   : > { %1442 = sst [smem:[#allocation14_spill]] %s1295_s17  ;;  %s1301_s19 = sshll.u32 (!%p314_p10), %s1425_s18, 3 }
  0x1a   : > { %p381_p13 = scmp.lt.s32.totalorder (!%p314_p10), %s1166_s27, 3  ;;  %s1443_s0 = sld [smem:[#allocation15_spill]] (!%p314_p10) }
  0x1b   : > { %p925_p0 = scmp.ne.s32.totalorder (!%p314_p10), %s1166_s27, 0 }
  0x1d   : > { %s371_s20 = scalar_select %p370_p12, %s1170_s28, 1 }
  0x1e   : > { %s382_s21 = scalar_select %p381_p13, %s1166_s27, 3 }
  0x1f   : > { %s916_s22 = sshll.u32 %s371_s20, 2  ;;  %404 = sbr.rel (%p925_p0) target bundleno = 38 (0x26), region = 52  ;;  %vm405_vm0 = vcmask (!%p925_p0), 261120   ;;  %v1184_v0 = vmov (!%p925_p0), 0.0  }
  0x20   : > { %s1309_s10 = scalar_lea.vmem %s1443_s0, %s916_s22  ;;  %s380_s12 = scalar_lea.vmem %s1415_s1, %s916_s22  ;;  %406 = vst.msk [vmem:[#allocation2] sm:$0xff] (!%p925_p0), %vm405_vm0, %v1184_v0 }
  0x21   : > { %s944_s11 = sshll.u32 %s382_s21, 4  ;;  %s924_s30 = sshll.u32 %s382_s21, 2 }
  0x22   : > { %s385_s18 = scalar_lea.vmem %s1416_s2, %s944_s11  ;;  %s390_s24 = scalar_lea.vmem %s1417_s3, %s944_s11 }
  0x23   : > { %s1323_s23 = scalar_lea.vmem %s1418_s4, %s944_s11  ;;  %s1328_s15 = scalar_lea.vmem %s1419_s5, %s924_s30 }
  0x24   : > { %s369_s22 = scalar_lea.vmem [#allocation3], %s1301_s19 }
  0x26 PF: > { %v1078_v1 = vld [vmem:[%s390_s24] sm:$0xff]   ;;  %v1185_v2 = vmov 0.0   ;;  %v1079_v3 = vld [vmem:[%s390_s24 + $0x8] sm:$0xff]   ;;  %vm1186_vm1 = vmmov 0   ;;  %vm425_vm2 = vcmask 261120   ;;  %vm586_vm3 = vcmask 64512  }
  0x27   : > { %970 = vmatprep.subr.bf16.mxu1 %v1185_v2  ;;  %962 = vmatprep.subr.bf16.mxu0 %v1185_v2  ;;  %v1080_v4 = vld [vmem:[%s385_s18] sm:$0xff]   ;;  %v1081_v5 = vld [vmem:[%s385_s18 + $0x8] sm:$0xff]   ;;  %vm649_vm4 = vcmask 1043456   ;;  %p938_p1 = scmp.ne.s32.totalorder %s1166_s27, 3 }
  0x28   : > { %971 = vmatpush3.bf16.msra.mxu1 %v1078_v1  ;;  %974 = vmatprep.mubr.msk.bf16.mxu1 %vm1186_vm1, %v1185_v2  ;;  %v408_v6 = vld [vmem:[%s380_s12] sm:$0xf]  ;;  %v1083_v20 = vld [vmem:[%s1323_s23 + $0x8] sm:$0xff]  }
  0x29   : > { %972 = vmatprep.subr.bf16.mxu1 %v1185_v2  ;;  %966 = vmatprep.mubr.msk.bf16.mxu0 %vm1186_vm1, %v1185_v2  ;;  %v407_v7 = vld [vmem:[%s1309_s10] sm:$0xf] }
  0x2a   : > { %963 = vmatpush3.bf16.msra.mxu0 %v1080_v4  ;;  %v1082_v19 = vld [vmem:[%s1323_s23] sm:$0xff]  }
  0x2b   : > { %964 = vmatprep.subr.bf16.mxu0 %v1185_v2  ;;  %v695_v37 = vld [vmem:[%s1328_s15] sm:$0xf] }
  0x2c   : > { %973 = vmatpush3.bf16.msra.mxu1 %v1079_v3  ;;  %v700_v38 = vsel %vm649_vm4, %v695_v37, 0  ;;  %v693_v48 = vld [vmem:[#allocation2] sm:$0xff] }
  0x2d   : > { %986 = vmatprep.subr.bf16.mxu1 %v1185_v2  ;;  %v939_v55 = vld [vmem:[%s1420_s6] ss:$0 sm:$0xff] (!%p938_p1) }
  0x2e   : > { %965 = vmatpush3.bf16.msra.mxu0 %v1081_v5 }
  0x2f   : > { %975 = vmatmul.mubr.msk.bf16.vlgmr.msra.gmra.mrb[0].mxu1 %vm425_vm2, %v408_v6  ;;  %978 = vmatprep.subr.bf16.mxu0 %v1185_v2 }
  0x30   : > { %988 = vmatprep.mubr.msk.bf16.mxu1 %vm1186_vm1, %v1185_v2 }
  0x31   : > { %967 = vmatmul.mubr.msk.bf16.vlgmr.msra.gmra.mrb[0].mxu0 %vm425_vm2, %v407_v7 }
  0x32   : > { %982 = vmatprep.mubr.msk.bf16.mxu0 %vm1186_vm1, %v1185_v2  ;;  %979 = vmatpush3.bf16.msra.mxu0 %v1082_v19 }
  0x33   : > { %980 = vmatprep.subr.bf16.mxu0 %v1185_v2 }
  0x36   : > { %981 = vmatpush3.bf16.msra.mxu0 %v1083_v20 }
  0x37   : > { %992 = vmatprep.subr.bf16.mxu0 %v1185_v2 }
  0x39   : > { %983 = vmatmul.mubr.msk.bf16.vlgmr.msra.gmra.mrb[4].mxu0 %vm425_vm2, %v408_v6 }
  0x3a   : > { %994 = vmatprep.mubr.msk.bf16.mxu0 %vm1186_vm1, %v1185_v2 }
 0x102   : > { %v522_v8 = vpop.f32.mrb[0].mxu1 }
 0x103   : > { %v585_v9 = vpack.c.bf16 %v522_v8, %v522_v8  ;;  %v976_v10 = vpop.f32.mrb[1].mxu1 }
 0x104   : > { %v525_v11 = vpop.f32.mrb[2].mxu1  ;;  %v463_v12 = vpop.f32.mrb[0].mxu0 }
 0x105   : > { %v591_v13 = vsel %vm586_vm3, %v585_v9, 0  ;;  %v977_v14 = vpop.f32.mrb[3].mxu1  ;;  %v968_v15 = vpop.f32.mrb[1].mxu0  ;;  %v584_v18 = vpack.c.bf16 %v463_v12, %v463_v12 }
 0x106   : > { %987 = vmatpush3.bf16.xpose.msra.mxu1 %v591_v13  ;;  %v466_v16 = vpop.f32.mrb[2].mxu0 }
 0x107   : > { %v969_v17 = vpop.f32.mrb[3].mxu0  ;;  %998 = vmatprep.subr.bf16.mxu1 %v1185_v2 }
 0x10c   : > { %v578_v31 = vpop.f32.mrb[4].mxu0 }
 0x10d   : > { %989 = vmatmul.mubr.msk.bf16.vlgmr.msra.gmra.mrb[4].mxu1 %vm586_vm3, %v584_v18  ;;  %v984_v32 = vpop.f32.mrb[5].mxu0  ;;  %v645_v35 = vpack.c.bf16 %v578_v31, %v578_v31 }
 0x10e   : > { %1000 = vmatprep.mubr.msk.bf16.mxu1 %vm1186_vm1, %v1185_v2  ;;  %v581_v33 = vpop.f32.mrb[6].mxu0  ;;  %999 = vmatpush3.bf16.msra.mxu1 %v700_v38 }
 0x10f   : > { %v985_v34 = vpop.f32.mrb[7].mxu0  ;;  %v651_v36 = vsel %vm649_vm4, %v645_v35, 0 }
 0x110   : > { %993 = vmatpush3.bf16.msra.mxu0 %v651_v36 }
 0x1e0   : > { %v627_v21 = vpop.f32.mrb[4].mxu1 }
 0x1e1   : > { %v990_v22 = vpop.f32.mrb[5].mxu1  ;;  %v633_v23 = vsel %vm586_vm3, %v627_v21, -inf }
 0x1e2   : > { %634 = vmax.xlane.f32.xlu0 %v633_v23  ;;  %v630_v24 = vpop.f32.mrb[6].mxu1 }
 0x1e3   : > { %v991_v25 = vpop.f32.mrb[7].mxu1 }
 0x26f   : > { %v635_v26 = vpop.xlane.xlu0 %634 }
 0x270   : > { %v636_v27 = vsub.f32 %v627_v21, %v635_v26 }
 0x272   : > { %v637_v28 = vmul.f32 1.442695, %v636_v27 }
 0x274   : > { %1084 = vpow2.f32 %v637_v28 }
 0x27e   : > { %v1085_v29 = vpop.eup %1084 }
 0x27f   : > { %v639_v30 = vsel %vm586_vm3, %v1085_v29, 0.0 }
 0x280   : > { %640 = vadd.xlane.f32.xlu0 %v639_v30 }
 0x30d   : > { %v641_v39 = vpop.xlane.xlu0 %640 }
 0x30e   : > { %1086 = vrcp.f32 %v641_v39 }
 0x318   : > { %v1087_v40 = vpop.eup %1086 }
 0x319   : > { %v643_v41 = vmul.f32 %v1087_v40, %v1085_v29 }
 0x31b   : > { %v644_v42 = vpack.c.bf16 %v643_v41, %v643_v41 }
 0x31d   : > { %995 = vmatmul.mubr.msk.bf16.vlgmr.msra.gmra.mrb[8].mxu0 %vm586_vm3, %v644_v42 }
 0x3f0   : > { %v687_v43 = vpop.f32.mrb[8].mxu0 }
 0x3f1   : > { %v694_v44 = vpack.c.bf16 %v687_v43, %v687_v43  ;;  %v996_v45 = vpop.f32.mrb[9].mxu0 }
 0x3f2   : > { %v690_v46 = vpop.f32.mrb[10].mxu0 }
 0x3f3   : > { %v997_v47 = vpop.f32.mrb[11].mxu0  ;;  %1001 = vmatmul.mubr.msk.bf16.vlgmr.msra.gmra.mrb[8].mxu1 %vm586_vm3, %v694_v44 }
 0x4c3   : > { %747 = sbr.rel (%p938_p1) target bundleno = 1236 (0x4d4), region = 56 }
 0x4c6   : > { %v736_v49 = vpop.f32.mrb[8].mxu1 }
 0x4c7   : > { %v742_v50 = vadd.f32 %v736_v49, %v693_v48  ;;  %v1002_v51 = vpop.f32.mrb[9].mxu1 }
 0x4c8   : > { %v739_v52 = vpop.f32.mrb[10].mxu1 }
 0x4c9   : > { %743 = vst.msk [vmem:[#allocation2] sm:$0xff] %vm425_vm2, %v742_v50  ;;  %v1003_v53 = vpop.f32.mrb[11].mxu1 }
 0x4d0   : > { %v748_v54 = vld [vmem:[#allocation2] sm:$0xff] }
 0x4d1   : > { %v756_v56 = vadd.f32 %v939_v55, %v748_v54 }
 0x4d3   : > { %757 = vst.msk [vmem:[%s369_s22] sm:$0xff] %vm425_vm2, %v756_v56 }
 0x4d4 PF: > { %s941_s26 = sshll.u32 %s1170_s28, 7  ;;  %s773_s8 = sshll.u32 %s369_s22, 4  ;;  %s774_s8 = int_to_ptr.vmem [resolvable:$true] %s773_s8 }
 0x4d5   : > { %s1363_s27 = scalar_lea.hbm %s1421_s7, %s941_s26  ;;  %s1444_s11 = sand.u32 1, %s1158_s25  }
 0x4d6   : > { %s759_s12 = scalar_lea.sflag [#allocation4], %s1444_s11  ;;  %s1088_s14 = scalar_lea.vmem %s774_s8, 128 }
 0x4d7   : > { %p1089_p2 = scmp.ne.s32.totalorder %s774_s8, %s1088_s14  ;;  %s1187_s17 = smov [#allocation3]  }
 0x4d8   : > { %s1092_s18 = sshll.u32 %s1187_s17, 4  ;;  %s1093_s18 = int_to_ptr.vmem [resolvable:$false] %s1092_s18 }
 0x4d9   : > { %p1090_p4 = pnand %p1089_p2, %p1277_p3  ;;  %s1094_s21 = scalar_lea.vmem %s1093_s18, 256 }
 0x4da   : > { %p1095_p6 = scmp.lt.s32.totalorder %s774_s8, %s1093_s18  ;;  %p1096_p7 = scmp.lt.s32.totalorder %s1094_s21, %s1088_s14 }
 0x4db   : > { %p1091_p5 = pneg %p1090_p4 }
 0x4dc   : > { %p1097_p8 = por %p1096_p7, %p1095_p6 }
 0x4de   : > { %p1098_p10 = pnand %p1097_p8, %p1091_p5 }
 0x4e0   : > { %1101 = shalt.err (!%p1098_p10)
}
 0x4e1   : > { %s1102_s28 = scalar_lea.hbm %s1363_s27, 128  ;;  %s1106_s16 = scalar_lea.hbm %s1421_s7, 256 }
 0x4e2   : > { %p1103_p11 = scmp.ne.s32.totalorder %s1363_s27, %s1102_s28  ;;  %p1107_p0 = scmp.lt.u32.totalorder %s1363_s27, %s1421_s7 }
 0x4e3   : > { %p1108_p1 = scmp.lt.u32.totalorder %s1106_s16, %s1102_s28  ;;  %p1110_p4 = scmp.lt.u32.totalorder %s1102_s28, %s1363_s27 }
 0x4e4   : > { %p1104_p12 = pnand %p1103_p11, %p1277_p3 }
 0x4e5   : > { %p1109_p2 = por %p1108_p1, %p1107_p0 }
 0x4e6   : > { %p1105_p13 = pneg %p1104_p12 }
 0x4e7   : > { %p1111_p5 = por %p1110_p4, %p1109_p2 }
 0x4e9   : > { %p1112_p6 = pnand %p1111_p5, %p1105_p13 }
 0x4eb   : > { %1115 = shalt.err (!%p1112_p6)
}
 0x4ec   : > { %1004 = dma.vmem_to_hbm [thread:$0]  (%p1277_p3), %s774_s8, 128, %s1363_s27, %s759_s12  }
 0x4ed PF: > { %s1445_s9 = sld [smem:[#allocation10_spill]]  ;;  %s1446_s15 = sld [smem:[#allocation6_spill]] }
 0x4f3   : > { %p1010_p7 = scmp.ge.s32.totalorder %s1445_s9, 2  ;;  %s785_s0 = sand.u32 1, %s1446_s15  }
 0x4f4   : > { %s786_s24 = scalar_lea.sflag [#allocation4], %s785_s0 }
 0x4f5   : > { %p1007_p8 = pnand %p1010_p7, %p1287_p9 }
 0x4f7   : > { %1149 = dma.done.wait (!%p1007_p8), %s786_s24, 128  }
 0x4f8   : > { %1151 = vsyncadd (!%p1007_p8), %s786_s24, 4294967168  ;;  %s20_s8 = sadd.s32 1, %s1445_s9   ;;  %s1448_s26 = sld [smem:[#allocation7_spill]] }
 0x4f9   : > { %p17_p10 = scmp.ge.s32.totalorder %s20_s8, 10   ;;  %s1449_s29 = sld [smem:[#allocation14_spill]] }
 0x4fa   : > { %s1450_s27 = sld [smem:[#allocation8_spill]]  ;;  %s1451_s28 = sld [smem:[#allocation9_spill]] }
 0x4fb   : > { %s1452_s13 = sld [smem:[#allocation11_spill]]  ;;  %s1453_s30 = sld [smem:[#allocation12_spill]] }
 0x4fc   : > { %s1454_s24 = smov %s1158_s25  ;;  %19 = sbr.rel (!%p17_p10) target bundleno = 7 (0x7), region = 106 }
 0x4fe   : > { %s1455_s25 = smov %s1448_s26 }
 0x4ff   : > { %s1456_s26 = smov %s1449_s29 }
 0x501   : > { %s1457_s29 = smov %s1452_s13 }
 0x503   :  { %791 = vsyncpa [#allocation4], 1 }
 0x504   :  { %793 = vsyncpa [#allocation4 + $0x1], 1 }

</bundles_post_ra>
